<compile_context>
chip_gen: v6e
topology: v6e:2x2x1
jax: 0.10.0
libtpu: 0.0.40
codegen_flags: <defaults>
</compile_context>

<pallas_src>
import functools

import jax
import jax.numpy as jnp
from jax.experimental import pallas as pl
from jax.experimental.pallas import tpu as pltpu


# ----------------------------------------------------------------------------
# Pallas kernel: one class tile per grid step.
# ----------------------------------------------------------------------------
def _lmcl_kernel(nemb_ref, w_ref, lab_ref,
                 logits_ref, mlogits_ref, norm_w_ref,
                 *, s, m, eps, tc, matmul_dtype):
    # ---- L2-normalize this tile of the class weights ------------------------
    # Per-row inverse norm (tc scalars) + a single full-tile multiply; no
    # (tc, Ep) elementwise divide.  max(||w||, eps) matches F.normalize.
    w = w_ref[...]                                                # (tc, Ep) f32
    sumsq = jnp.sum(w * w, axis=1, keepdims=True)                 # (tc, 1)
    inv_nrm = 1.0 / jnp.maximum(jnp.sqrt(sumsq), eps)             # (tc, 1)
    norm_w = w * inv_nrm                                          # (tc, Ep)

    # ---- cosine logits: norm_emb @ norm_w^T on the MXU, f32 accumulation ----
    nemb = nemb_ref[...]                                          # (Bp, Ep), already normalized
    logits = jax.lax.dot_general(
        nemb.astype(matmul_dtype), norm_w.astype(matmul_dtype),
        dimension_numbers=(((1,), (1,)), ((), ())),
        preferred_element_type=jnp.float32)                       # (Bp, tc)

    # ---- margin "scatter_" via iota compare (no one-hot) + s scaling --------
    col = (jax.lax.broadcasted_iota(jnp.int32, logits.shape, 1)
           + pl.program_id(0) * tc)
    margin = jnp.where(col == lab_ref[...], jnp.float32(m), jnp.float32(0.0))
    mlogits = s * (logits - margin)

    logits_ref[...] = logits
    mlogits_ref[...] = mlogits
    norm_w_ref[...] = norm_w


# ----------------------------------------------------------------------------
# Helpers
# ----------------------------------------------------------------------------
def _round_up(x, mult):
    return mult * ((x + mult - 1) // mult)


def _vmem_capacity_bytes():
    """Physical VMEM per TensorCore; conservative fallback = v7x (64 MiB)."""
    try:
        info = pltpu.get_tpu_info()
        cap = getattr(info, "vmem_capacity_bytes", None)
        if cap:
            return int(cap)
    except Exception:
        pass
    return 64 * 1024 * 1024


def _choose_class_tile(Bp, Ep, C, vmem_budget_bytes):
    """Largest multiple-of-128 class tile fitting the per-step VMEM budget."""
    # Resident (grid-invariant) inputs: normalized embedding + lane-padded labels,
    # double-buffered by the pipeline.
    resident = 2 * Bp * Ep * 4 + 2 * Bp * 128 * 4
    # Per 128-wide slice of tc: weight-in (2 bufs) + norm_w-out (2 bufs)
    # + logits/mlogits-out (2 bufs each).
    per_128 = 4 * 128 * Ep * 4 + 4 * Bp * 128 * 4
    avail = max(vmem_budget_bytes - resident, 0)
    n128 = max(int(avail // per_128), 1)
    tc = min(n128, 8) * 128                       # cap tile width at 1024
    tc = max(128, min(tc, _round_up(C, 128)))     # never wider than needed
    needed = resident + 4 * tc * Ep * 4 + 4 * Bp * tc * 4
    return tc, needed


def _l2_normalize(x, eps):
    nrm = jnp.sqrt(jnp.sum(x * x, axis=1, keepdims=True))
    return x / jnp.maximum(nrm, eps)


# ----------------------------------------------------------------------------
# Wrapper
# ----------------------------------------------------------------------------
def lmcl_forward(embedding, weights, label, *, s, m, eps=1e-12,
                 matmul_dtype=None):
    """Pallas implementation of LMCL.forward.

    Returns (logits, m_logits, s * normalize(embedding), normalize(weights)).
    """
    B, E = embedding.shape
    C, E2 = weights.shape
    assert E == E2, "embedding size wrong"

    if matmul_dtype is None:
        # bf16 MXU operands (with f32 accumulation) once the matmul actually
        # dominates; exact f32 path for small sizes.
        matmul_dtype = jnp.bfloat16 if (B * C * E >= (1 << 24)) else jnp.float32

    # --- geometry: pad to (8, 128) tiling; Cp is a multiple of the chosen tc --
    Bp = _round_up(B, 8)
    Ep = _round_up(E, 128)

    vmem_cap = _vmem_capacity_bytes()
    tc, vmem_needed = _choose_class_tile(Bp, Ep, C, vmem_cap // 4)
    Cp = _round_up(C, tc)
    vmem_limit = int(min(max(2 * vmem_needed, 32 << 20), vmem_cap // 2))

    # --- embedding normalization: tiny (B x E), done once, fed in resident ---
    norm_emb = _l2_normalize(embedding.astype(jnp.float32), eps)
    if (Bp - B) or (Ep - E):
        nemb_p = jnp.pad(norm_emb, ((0, Bp - B), (0, Ep - E)))
    else:
        nemb_p = norm_emb

    # --- weights: only pad (extra HBM copy) when actually misaligned ---------
    # Zero padding is exact: zero rows/cols contribute nothing to norms or dots.
    w_f32 = weights.astype(jnp.float32)
    if (Cp - C) or (Ep - E):
        w_p = jnp.pad(w_f32, ((0, Cp - C), (0, Ep - E)))
    else:
        w_p = w_f32

    lab_p = jnp.pad(label.astype(jnp.int32).reshape(B, 1), ((0, Bp - B), (0, 0)))

    kernel = functools.partial(_lmcl_kernel, s=float(s), m=float(m),
                               eps=float(eps), tc=tc, matmul_dtype=matmul_dtype)

    logits_p, mlogits_p, norm_w_p = pl.pallas_call(
        kernel,
        out_shape=(
            jax.ShapeDtypeStruct((Bp, Cp), jnp.float32),   # logits
            jax.ShapeDtypeStruct((Bp, Cp), jnp.float32),   # m_logits
            jax.ShapeDtypeStruct((Cp, Ep), jnp.float32),   # norm(weights)
        ),
        grid_spec=pltpu.PrefetchScalarGridSpec(
            num_scalar_prefetch=0,
            grid=(Cp // tc,),
            in_specs=[
                pl.BlockSpec((Bp, Ep), lambda c: (0, 0)),   # normalized embedding (resident)
                pl.BlockSpec((tc, Ep), lambda c: (c, 0)),   # weight tile
                pl.BlockSpec((Bp, 1), lambda c: (0, 0)),    # labels (resident)
            ],
            out_specs=[
                pl.BlockSpec((Bp, tc), lambda c: (0, c)),
                pl.BlockSpec((Bp, tc), lambda c: (0, c)),
                pl.BlockSpec((tc, Ep), lambda c: (c, 0)),
            ],
        ),
        compiler_params=pltpu.CompilerParams(
            # Every output block is written by exactly one grid step, so the
            # class axis can be megacore-parallel (helps v7x; neutral v5e/v6e).
            dimension_semantics=("parallel",),
            vmem_limit_bytes=vmem_limit),
    )(nemb_p, w_p, lab_p)

    logits = logits_p[:B, :C] if (Bp != B or Cp != C) else logits_p
    mlogits = mlogits_p[:B, :C] if (Bp != B or Cp != C) else mlogits_p
    norm_w = norm_w_p[:C, :E] if (Cp != C or Ep != E) else norm_w_p
    return logits, mlogits, s * norm_emb, norm_w


# ----------------------------------------------------------------------------
# Plain-JAX reference (mirrors the PyTorch module) for a sanity check
# ----------------------------------------------------------------------------
def lmcl_reference(embedding, weights, label, *, s, m, eps=1e-12):
    ne = _l2_normalize(embedding.astype(jnp.float32), eps)
    nw = _l2_normalize(weights.astype(jnp.float32), eps)
    logits = jnp.dot(ne, nw.T, precision=jax.lax.Precision.HIGHEST)
    margin = m * jax.nn.one_hot(label, weights.shape[0], dtype=logits.dtype)
    return logits, s * (logits - margin), s * ne, nw


if __name__ == "__main__":
    key = jax.random.PRNGKey(0)
    ekey, wkey, lkey = jax.random.split(key, 3)

    batch = 2
    embedding_size = 32
    num_classes = 300
    s_scale = 30.0
    m_margin = 0.35

    embedding = jax.random.normal(ekey, (batch, embedding_size), jnp.float32)
    # kaiming_normal_ on (num_classes, embedding_size): std = sqrt(2 / fan_in)
    weights = (jax.random.normal(wkey, (num_classes, embedding_size), jnp.float32)
               * jnp.sqrt(2.0 / embedding_size))
    label = jax.random.randint(lkey, (batch,), 0, num_classes, jnp.int32)

    fwd = jax.jit(functools.partial(lmcl_forward, s=s_scale, m=m_margin))
    logits, m_logits, s_norm_emb, norm_w = fwd(embedding, weights, label)
    jax.block_until_ready((logits, m_logits, s_norm_emb, norm_w))

    assert logits.shape == (batch, num_classes)
    assert m_logits.shape == (batch, num_classes)
    assert s_norm_emb.shape == (batch, embedding_size)
    assert norm_w.shape == (num_classes, embedding_size)

    # sanity check against the plain-JAX reference (f32 path -> tight tolerance)
    ref = lmcl_reference(embedding, weights, label, s=s_scale, m=m_margin)
    for name, got, want in zip(("logits", "m_logits", "s_norm_emb", "norm_w"),
                               (logits, m_logits, s_norm_emb, norm_w), ref):
        err = float(jnp.max(jnp.abs(got - want)))
        assert jnp.allclose(got, want, atol=5e-4, rtol=5e-4), (name, err)

    print("KERNEL_OK")
</pallas_src>

<mosaic_0001>
module attributes {stable_mosaic.version = 11 : i64} {
  func.func @_lmcl_kernel(%arg0: i32, %arg1: memref<8x128xf32, #tpu.memory_space<vmem>>, %arg2: memref<384x128xf32, #tpu.memory_space<vmem>>, %arg3: memref<8x1xi32, #tpu.memory_space<vmem>>, %arg4: memref<8x384xf32, #tpu.memory_space<vmem>>, %arg5: memref<8x384xf32, #tpu.memory_space<vmem>>, %arg6: memref<384x128xf32, #tpu.memory_space<vmem>>) attributes {dimension_semantics = [#tpu.dimension_semantics<parallel>], iteration_bounds = array<i64: 1>, scalar_prefetch = 0 : i64, scratch_operands = 0 : i64, tpu.core_type = #tpu.core_type<tc>, window_params = [{pipeline_mode = #tpu.pipeline_mode<synchronous>, transform_indices = @transform_0, window_bounds = array<i64: 8, 128>}, {transform_indices = @transform_1, window_bounds = array<i64: 384, 128>}, {pipeline_mode = #tpu.pipeline_mode<synchronous>, transform_indices = @transform_2, window_bounds = array<i64: 8, 1>}, {transform_indices = @transform_3, window_bounds = array<i64: 8, 384>}, {transform_indices = @transform_4, window_bounds = array<i64: 8, 384>}, {transform_indices = @transform_5, window_bounds = array<i64: 384, 128>}]} {
    %c0 = arith.constant 0 : index
    %c0_0 = arith.constant 0 : index
    %0 = vector.load %arg2[%c0, %c0_0] : memref<384x128xf32, #tpu.memory_space<vmem>>, vector<384x128xf32>
    %1 = arith.mulf %0, %0 : vector<384x128xf32>
    %cst = arith.constant dense<0.000000e+00> : vector<384xf32>
    %2 = vector.multi_reduction <add>, %1, %cst [1] : vector<384x128xf32> to vector<384xf32>
    %3 = vector.shape_cast %2 : vector<384xf32> to vector<384x1xf32>
    %4 = math.sqrt %3 : vector<384x1xf32>
    %cst_1 = arith.constant 9.99999996E-13 : f32
    %5 = vector.broadcast %cst_1 : f32 to vector<384x1xf32>
    %6 = arith.maximumf %4, %5 : vector<384x1xf32>
    %cst_2 = arith.constant 1.000000e+00 : f32
    %7 = vector.broadcast %cst_2 : f32 to vector<384x1xf32>
    %8 = arith.divf %7, %6 : vector<384x1xf32>
    %9 = vector.broadcast %8 : vector<384x1xf32> to vector<384x128xf32>
    %10 = arith.mulf %0, %9 : vector<384x128xf32>
    %c0_3 = arith.constant 0 : index
    %c0_4 = arith.constant 0 : index
    %11 = vector.load %arg1[%c0_3, %c0_4] : memref<8x128xf32, #tpu.memory_space<vmem>>, vector<8x128xf32>
    %cst_5 = arith.constant dense<0.000000e+00> : vector<8x384xf32>
    %12 = tpu.matmul %11, %10, %cst_5 {dimension_numbers = #tpu.dot_dimension_numbers<[1], [1], [0], [0], [0, 0, 1, 0], [], []>} : vector<8x128xf32>, vector<384x128xf32>, vector<8x384xf32> -> vector<8x384xf32>
    %13 = tpu.iota {dimensions = array<i32: 1>} : vector<8x384xi32>
    %c384_i32 = arith.constant 384 : i32
    %14 = arith.muli %arg0, %c384_i32 : i32
    %15 = vector.broadcast %14 : i32 to vector<8x384xi32>
    %16 = arith.addi %13, %15 : vector<8x384xi32>
    %c0_6 = arith.constant 0 : index
    %c0_7 = arith.constant 0 : index
    %17 = vector.load %arg3[%c0_6, %c0_7] : memref<8x1xi32, #tpu.memory_space<vmem>>, vector<8x1xi32>
    %18 = vector.broadcast %17 : vector<8x1xi32> to vector<8x384xi32>
    %19 = arith.cmpi eq, %16, %18 : vector<8x384xi32>
    %cst_8 = arith.constant 3.500000e-01 : f32
    %cst_9 = arith.constant 0.000000e+00 : f32
    %20 = vector.broadcast %cst_8 : f32 to vector<8x384xf32>
    %21 = vector.broadcast %cst_9 : f32 to vector<8x384xf32>
    %22 = arith.select %19, %20, %21 : vector<8x384xi1>, vector<8x384xf32>
    %23 = arith.subf %12, %22 : vector<8x384xf32>
    %cst_10 = arith.constant 3.000000e+01 : f32
    %24 = vector.broadcast %cst_10 : f32 to vector<8x384xf32>
    %25 = arith.mulf %24, %23 : vector<8x384xf32>
    %c0_11 = arith.constant 0 : index
    %c0_12 = arith.constant 0 : index
    %26 = vector.load %arg4[%c0_11, %c0_12] : memref<8x384xf32, #tpu.memory_space<vmem>>, vector<8x384xf32>
    tpu.vector_store %arg4[%c0_11, %c0_12], %12 {strides = array<i32>} : memref<8x384xf32, #tpu.memory_space<vmem>>, vector<8x384xf32>,
    %c0_13 = arith.constant 0 : index
    %c0_14 = arith.constant 0 : index
    %27 = vector.load %arg5[%c0_13, %c0_14] : memref<8x384xf32, #tpu.memory_space<vmem>>, vector<8x384xf32>
    tpu.vector_store %arg5[%c0_13, %c0_14], %25 {strides = array<i32>} : memref<8x384xf32, #tpu.memory_space<vmem>>, vector<8x384xf32>,
    %c0_15 = arith.constant 0 : index
    %c0_16 = arith.constant 0 : index
    %28 = vector.load %arg6[%c0_15, %c0_16] : memref<384x128xf32, #tpu.memory_space<vmem>>, vector<384x128xf32>
    tpu.vector_store %arg6[%c0_15, %c0_16], %10 {strides = array<i32>} : memref<384x128xf32, #tpu.memory_space<vmem>>, vector<384x128xf32>,
    return
  }
  func.func @transform_0(%arg0: i32) -> (i32, i32) {
    %c0_i32 = arith.constant 0 : i32
    %c0_i32_0 = arith.constant 0 : i32
    %c0_i32_1 = arith.constant 0 : i32
    return %c0_i32, %c0_i32_0 : i32, i32
  }
  func.func @transform_1(%arg0: i32) -> (i32, i32) {
    %c0_i32 = arith.constant 0 : i32
    %c0_i32_0 = arith.constant 0 : i32
    return %arg0, %c0_i32 : i32, i32
  }
  func.func @transform_2(%arg0: i32) -> (i32, i32) {
    %c0_i32 = arith.constant 0 : i32
    %c0_i32_0 = arith.constant 0 : i32
    %c0_i32_1 = arith.constant 0 : i32
    return %c0_i32, %c0_i32_0 : i32, i32
  }
  func.func @transform_3(%arg0: i32) -> (i32, i32) {
    %c0_i32 = arith.constant 0 : i32
    %c0_i32_0 = arith.constant 0 : i32
    return %c0_i32, %arg0 : i32, i32
  }
  func.func @transform_4(%arg0: i32) -> (i32, i32) {
    %c0_i32 = arith.constant 0 : i32
    %c0_i32_0 = arith.constant 0 : i32
    return %c0_i32, %arg0 : i32, i32
  }
  func.func @transform_5(%arg0: i32) -> (i32, i32) {
    %c0_i32 = arith.constant 0 : i32
    %c0_i32_0 = arith.constant 0 : i32
    return %arg0, %c0_i32 : i32, i32
  }
}

</mosaic_0001>

<bundles_post_ra>
// kernel: lmcl_forward.1
= control target key start
LH: loop header
LB: loop body
LE: loop exit
PB: predicated region body
PF: predicated region fallthrough
CT: control target
= control target key end

     0   :  { %v1285_v58 = vmov 0.0   ;;  %s2398_s1 = inlined_call_operand.vmem [shape: f32[384,128], index: 1, kind: input, shape index: {}]   ;;  %s2399_s0 = inlined_call_operand.vmem [shape: f32[8,128], index: 0, kind: input, shape index: {}]   ;;  %s2400_s5 = inlined_call_operand.vmem [shape: f32[384,128], index: 5, kind: output, shape index: {2}]   ;;  %s2401_s2 = inlined_call_operand.vmem [shape: s32[8,1], index: 2, kind: input, shape index: {}]   ;;  %s2402_s3 = inlined_call_operand.vmem [shape: f32[8,384], index: 3, kind: output, shape index: {0}]   ;;  %s2403_s4 = inlined_call_operand.vmem [shape: f32[8,384], index: 4, kind: output, shape index: {1}]  }
   0x1   :  { %v1321_v0 = vld [vmem:[%s2398_s1 + $0x178] sm:$0xff]  ;;  %v1331_v2 = vld [vmem:[%s2398_s1 + $0xf0] sm:$0xff]  ;;  %v1363_v12 = vld [vmem:[%s2398_s1 + $0xe8] sm:$0xff]  ;;  %1021 = vmatprep.subr.mxu1 %v1285_v58 }
   0x2   :  { %v1326_v1 = vld [vmem:[%s2398_s1 + $0xf8] sm:$0xff]  ;;  %v112_v3 = vmul.f32 %v1321_v0, %v1321_v0  ;;  %v95_v6 = vmul.f32 %v1331_v2, %v1331_v2  ;;  %v1349_v8 = vld [vmem:[%s2398_s1 + $0x170] sm:$0xff]  ;;  %v1368_v13 = vld [vmem:[%s2398_s1 + $0x68] sm:$0xff]  ;;  %v94_v14 = vmul.f32 %v1363_v12, %v1363_v12 }
   0x3   :  { %v96_v4 = vmul.f32 %v1326_v1, %v1326_v1  ;;  %v1340_v5 = vld [vmem:[%s2398_s1 + $0x78] sm:$0xff]  ;;  %v1354_v9 = vld [vmem:[%s2398_s1 + $0x70] sm:$0xff]  ;;  %v111_v10 = vmul.f32 %v1349_v8, %v1349_v8  ;;  %v78_v15 = vmul.f32 %v1368_v13, %v1368_v13  ;;  %v1377_v16 = vld [vmem:[%s2398_s1 + $0x168] sm:$0xff] }
   0x4   :  { %207 = vadd.xlane.f32.xlu1 %v112_v3  ;;  %v80_v7 = vmul.f32 %v1340_v5, %v1340_v5  ;;  %v79_v11 = vmul.f32 %v1354_v9, %v1354_v9  ;;  %v1382_v17 = vld [vmem:[%s2398_s1 + $0xe0] sm:$0xff]  ;;  %v110_v18 = vmul.f32 %v1377_v16, %v1377_v16  ;;  %v1405_v24 = vld [vmem:[%s2398_s1 + $0xd8] sm:$0xff]  ;;  %v1424_v29 = vld [vmem:[%s2398_s1 + $0xd0] sm:$0xff] }
   0x5   :  { %175 = vadd.xlane.f32.xlu0 %v96_v4  ;;  %v93_v19 = vmul.f32 %v1382_v17, %v1382_v17  ;;  %v1391_v20 = vld [vmem:[%s2398_s1 + $0x160] sm:$0xff]  ;;  %v1410_v25 = vld [vmem:[%s2398_s1 + $0x58] sm:$0xff]  ;;  %v92_v26 = vmul.f32 %v1405_v24, %v1405_v24  ;;  %v91_v31 = vmul.f32 %v1424_v29, %v1424_v29  ;;  %v59_v32 = vld [vmem:[%s2398_s1 + $0x150] sm:$0xff] }
   0x6   :  { %v1396_v21 = vld [vmem:[%s2398_s1 + $0x60] sm:$0xff]  ;;  %v109_v22 = vmul.f32 %v1391_v20, %v1391_v20  ;;  %v76_v27 = vmul.f32 %v1410_v25, %v1410_v25  ;;  %v1419_v28 = vld [vmem:[%s2398_s1 + $0x158] sm:$0xff]  ;;  %v27_v33 = vld [vmem:[%s2398_s1 + $0x50] sm:$0xff]  ;;  %v107_v34 = vmul.f32 %v59_v32, %v59_v32 }
   0x7   :  { %v77_v23 = vmul.f32 %v1396_v21, %v1396_v21  ;;  %v108_v30 = vmul.f32 %v1419_v28, %v1419_v28  ;;  %v75_v35 = vmul.f32 %v27_v33, %v27_v33  ;;  %v42_v36 = vld [vmem:[%s2398_s1 + $0xc8] sm:$0xff]  ;;  %v41_v41 = vld [vmem:[%s2398_s1 + $0xc0] sm:$0xff]  ;;  %v40_v48 = vld [vmem:[%s2398_s1 + $0xb8] sm:$0xff] }
   0x8   :  { %173 = vadd.xlane.f32.xlu1 %v95_v6  ;;  %v26_v37 = vld [vmem:[%s2398_s1 + $0x48] sm:$0xff]  ;;  %v90_v38 = vmul.f32 %v42_v36, %v42_v36  ;;  %v89_v43 = vmul.f32 %v41_v41, %v41_v41  ;;  %v57_v44 = vld [vmem:[%s2398_s1 + $0x140] sm:$0xff]  ;;  %v24_v49 = vld [vmem:[%s2398_s1 + $0x38] sm:$0xff]  ;;  %v88_v50 = vmul.f32 %v40_v48, %v40_v48 }
   0x9   :  { %143 = vadd.xlane.f32.xlu0 %v80_v7  ;;  %v74_v39 = vmul.f32 %v26_v37, %v26_v37  ;;  %v58_v40 = vld [vmem:[%s2398_s1 + $0x148] sm:$0xff]  ;;  %v25_v45 = vld [vmem:[%s2398_s1 + $0x40] sm:$0xff]  ;;  %v105_v46 = vmul.f32 %v57_v44, %v57_v44  ;;  %v72_v51 = vmul.f32 %v24_v49, %v24_v49  ;;  %v56_v52 = vld [vmem:[%s2398_s1 + $0x138] sm:$0xff] }
   0xa   :  { %v106_v42 = vmul.f32 %v58_v40, %v58_v40  ;;  %v73_v47 = vmul.f32 %v25_v45, %v25_v45  ;;  %v39_v53 = vld [vmem:[%s2398_s1 + $0xb0] sm:$0xff]  ;;  %v104_v54 = vmul.f32 %v56_v52, %v56_v52  ;;  %v38_v61 = vld [vmem:[%s2398_s1 + $0xa8] sm:$0xff]  ;;  %v37_v6 = vld [vmem:[%s2398_s1 + $0xa0] sm:$0xff] }
   0xb   :  { %v87_v55 = vmul.f32 %v39_v53, %v39_v53  ;;  %v55_v56 = vld [vmem:[%s2398_s1 + $0x130] sm:$0xff]  ;;  %v22_v62 = vld [vmem:[%s2398_s1 + $0x28] sm:$0xff]  ;;  %v86_v63 = vmul.f32 %v38_v61, %v38_v61  ;;  %v49_v45 = vld [vmem:[%s2398_s1 + $0x100] sm:$0xff] }
   0xc   :  { %205 = vadd.xlane.f32.xlu1 %v111_v10  ;;  %v23_v57 = vld [vmem:[%s2398_s1 + $0x30] sm:$0xff]  ;;  %v103_v59 = vmul.f32 %v55_v56, %v55_v56  ;;  %v70_v3 = vmul.f32 %v22_v62, %v22_v62  ;;  %v54_v4 = vld [vmem:[%s2398_s1 + $0x128] sm:$0xff]  ;;  %v85_v10 = vmul.f32 %v37_v6, %v37_v6 }
   0xd   :  { %141 = vadd.xlane.f32.xlu0 %v79_v11  ;;  %v71_v60 = vmul.f32 %v23_v57, %v23_v57  ;;  %v102_v7 = vmul.f32 %v54_v4, %v54_v4  ;;  %v53_v11 = vld [vmem:[%s2398_s1 + $0x120] sm:$0xff]  ;;  %v51_v33 = vld [vmem:[%s2398_s1 + $0x110] sm:$0xff]  ;;  %v34_v37 = vld [vmem:[%s2398_s1 + $0x88] sm:$0xff] }
   0xe   :  { %v50_v41 = vld [vmem:[%s2398_s1 + $0x108] sm:$0xff] }
  0x10   :  { %139 = vadd.xlane.f32.xlu1 %v78_v15  ;;  %v101_v15 = vmul.f32 %v53_v11, %v53_v11 }
  0x11   :  { %171 = vadd.xlane.f32.xlu0 %v94_v14  ;;  %v21_v14 = vld [vmem:[%s2398_s1 + $0x20] sm:$0xff] }
  0x14   :  { %169 = vadd.xlane.f32.xlu1 %v93_v19  ;;  %v36_v19 = vld [vmem:[%s2398_s1 + $0x98] sm:$0xff] }
  0x15   :  { %203 = vadd.xlane.f32.xlu0 %v110_v18  ;;  %v69_v18 = vmul.f32 %v21_v14, %v21_v14 }
  0x18   :  { %201 = vadd.xlane.f32.xlu1 %v109_v22  ;;  %v20_v22 = vld [vmem:[%s2398_s1 + $0x18] sm:$0xff] }
  0x19   :  { %137 = vadd.xlane.f32.xlu0 %v77_v23  ;;  %v84_v23 = vmul.f32 %v36_v19, %v36_v19 }
  0x1c   :  { %135 = vadd.xlane.f32.xlu1 %v76_v27  ;;  %v52_v27 = vld [vmem:[%s2398_s1 + $0x118] sm:$0xff] }
  0x1d   :  { %167 = vadd.xlane.f32.xlu0 %v92_v26  ;;  %v68_v26 = vmul.f32 %v20_v22, %v20_v22 }
  0x20   :  { %165 = vadd.xlane.f32.xlu1 %v91_v31  ;;  %v100_v31 = vmul.f32 %v52_v27, %v52_v27 }
  0x21   :  { %199 = vadd.xlane.f32.xlu0 %v108_v30  ;;  %v35_v30 = vld [vmem:[%s2398_s1 + $0x90] sm:$0xff] }
  0x22   :  { %v83_v32 = vmul.f32 %v35_v30, %v35_v30 }
  0x24   :  { %197 = vadd.xlane.f32.xlu1 %v107_v34  ;;  %v19_v34 = vld [vmem:[%s2398_s1 + $0x10] sm:$0xff] }
  0x25   :  { %133 = vadd.xlane.f32.xlu0 %v75_v35  ;;  %v99_v35 = vmul.f32 %v51_v33, %v51_v33  ;;  %v67_v36 = vmul.f32 %v19_v34, %v19_v34 }
  0x28   :  { %131 = vadd.xlane.f32.xlu1 %v74_v39  ;;  %v82_v39 = vmul.f32 %v34_v37, %v34_v37 }
  0x29   :  { %163 = vadd.xlane.f32.xlu0 %v90_v38  ;;  %v18_v38 = vld [vmem:[%s2398_s1 + $0x8] sm:$0xff] }
  0x2a   :  { %v66_v40 = vmul.f32 %v18_v38, %v18_v38 }
  0x2c   :  { %161 = vadd.xlane.f32.xlu1 %v89_v43  ;;  %v98_v43 = vmul.f32 %v50_v41, %v50_v41 }
  0x2d   :  { %195 = vadd.xlane.f32.xlu0 %v106_v42  ;;  %v33_v42 = vld [vmem:[%s2398_s1 + $0x80] sm:$0xff] }
  0x2e   :  { %v81_v44 = vmul.f32 %v33_v42, %v33_v42 }
  0x30   :  { %193 = vadd.xlane.f32.xlu1 %v105_v46  ;;  %v17_v46 = vld [vmem:[%s2398_s1] sm:$0xff] }
  0x31   :  { %129 = vadd.xlane.f32.xlu0 %v73_v47  ;;  %v97_v47 = vmul.f32 %v49_v45, %v49_v45  ;;  %v65_v48 = vmul.f32 %v17_v46, %v17_v46 }
  0x34   :  { %127 = vadd.xlane.f32.xlu1 %v72_v51 }
  0x35   :  { %159 = vadd.xlane.f32.xlu0 %v88_v50 }
  0x38   :  { %157 = vadd.xlane.f32.xlu1 %v87_v55 }
  0x39   :  { %191 = vadd.xlane.f32.xlu0 %v104_v54 }
  0x3c   :  { %189 = vadd.xlane.f32.xlu1 %v103_v59 }
  0x3d   :  { %125 = vadd.xlane.f32.xlu0 %v71_v60 }
  0x40   :  { %123 = vadd.xlane.f32.xlu1 %v70_v3 }
  0x41   :  { %155 = vadd.xlane.f32.xlu0 %v86_v63 }
  0x44   :  { %153 = vadd.xlane.f32.xlu1 %v85_v10 }
  0x45   :  { %187 = vadd.xlane.f32.xlu0 %v102_v7 }
  0x48   :  { %185 = vadd.xlane.f32.xlu1 %v101_v15 }
  0x49   :  { %121 = vadd.xlane.f32.xlu0 %v69_v18 }
  0x4c   :  { %119 = vadd.xlane.f32.xlu1 %v68_v26 }
  0x4d   :  { %151 = vadd.xlane.f32.xlu0 %v84_v23 }
  0x50   :  { %149 = vadd.xlane.f32.xlu1 %v83_v32  ;;  %v737_v32 = vld [vmem:[%s2399_s0] sm:$0xff] }
  0x51   :  { %183 = vadd.xlane.f32.xlu0 %v100_v31  ;;  %1002 = vmatprep.mubr.f32.mxu0 %v737_v32 }
  0x54   :  { %181 = vadd.xlane.f32.xlu1 %v99_v35 }
  0x55   :  { %117 = vadd.xlane.f32.xlu0 %v67_v36 }
  0x58   :  { %115 = vadd.xlane.f32.xlu1 %v66_v40 }
  0x59   :  { %147 = vadd.xlane.f32.xlu0 %v82_v39 }
  0x5c   :  { %145 = vadd.xlane.f32.xlu1 %v81_v44 }
  0x5d   :  { %179 = vadd.xlane.f32.xlu0 %v98_v43 }
  0x60   :  { %177 = vadd.xlane.f32.xlu1 %v97_v47 }
  0x61   :  { %113 = vadd.xlane.f32.xlu0 %v65_v48 }
  0x8d   :  { %v208_v49 = vpop.xlane.xlu1 %207 }
  0x8e   :  { %v176_v50 = vpop.xlane.xlu0 %175  ;;  %1060 = vrsqrt.f32 %v208_v49  ;;  %vm540_vm0 = vcmp.eq.f32.partialorder %v208_v49, inf  ;;  %vm542_vm1 = vcmp.eq.f32.partialorder %v208_v49, 0.0  ;;  %v543_v61 = vand.u32 2147483648, %v208_v49 }
  0x8f   :  { %1062 = vrsqrt.f32 %v176_v50  ;;  %vm428_vm2 = vcmp.eq.f32.partialorder %v176_v50, inf  ;;  %vm430_vm3 = vcmp.eq.f32.partialorder %v176_v50, 0.0  ;;  %v431_v4 = vand.u32 2147483648, %v176_v50 }
  0x91   :  { %v174_v51 = vpop.xlane.xlu1 %173 }
  0x92   :  { %v144_v52 = vpop.xlane.xlu0 %143  ;;  %1064 = vrsqrt.f32 %v174_v51  ;;  %vm421_vm4 = vcmp.eq.f32.partialorder %v174_v51, inf  ;;  %vm423_vm5 = vcmp.eq.f32.partialorder %v174_v51, 0.0  ;;  %v424_v11 = vand.u32 2147483648, %v174_v51 }
  0x93   :  { %1066 = vrsqrt.f32 %v144_v52  ;;  %vm316_vm6 = vcmp.eq.f32.partialorder %v144_v52, inf  ;;  %vm318_vm7 = vcmp.eq.f32.partialorder %v144_v52, 0.0  ;;  %v319_v22 = vand.u32 2147483648, %v144_v52 }
  0x95   :  { %v1527_v53 = vpop.xlane.xlu1 %205 }
  0x96   :  { %v1529_v54 = vpop.xlane.xlu0 %141  ;;  %1068 = vrsqrt.f32 %v1527_v53  ;;  %vm533_vm8 = vcmp.eq.f32.partialorder %v1527_v53, inf  ;;  %vm535_vm9 = vcmp.eq.f32.partialorder %v1527_v53, 0.0  ;;  %v536_v31 = vand.u32 2147483648, %v1527_v53 }
  0x97   :  { %1070 = vrsqrt.f32 %v1529_v54  ;;  %vm309_vm10 = vcmp.eq.f32.partialorder %v1529_v54, inf  ;;  %vm311_vm11 = vcmp.eq.f32.partialorder %v1529_v54, 0.0  ;;  %v312_v40 = vand.u32 2147483648, %v1529_v54 }
  0x99   :  { %v1535_v56 = vpop.xlane.xlu1 %139 }
  0x9a   :  { %v1533_v55 = vpop.xlane.xlu0 %171  ;;  %vm302_vm14 = vcmp.eq.f32.partialorder %v1535_v56, inf  ;;  %vm304_vm15 = vcmp.eq.f32.partialorder %v1535_v56, 0.0 }
  0x9b   :  { %1072 = vrsqrt.f32 %v1533_v55  ;;  %v1061_v57 = vpop.eup %1060  ;;  %vm414_vm12 = vcmp.eq.f32.partialorder %v1533_v55, inf  ;;  %vm416_vm13 = vcmp.eq.f32.partialorder %v1533_v55, 0.0  ;;  %v417_v47 = vand.u32 2147483648, %v1533_v55 }
  0x9c   :  { %1074 = vrsqrt.f32 %v1535_v56  ;;  %v1063_v59 = vpop.eup %1062  ;;  %v539_v60 = vmul.f32 %v1061_v57, %v208_v49 }
  0x9d   :  { %v427_v62 = vmul.f32 %v1063_v59, %v176_v50  ;;  %v1541_v3 = vpop.xlane.xlu1 %169 }
  0x9e   :  { %v1539_v63 = vpop.xlane.xlu0 %203  ;;  %v541_v7 = vsel %vm540_vm0, %v208_v49, %v539_v60  ;;  %v305_v60 = vand.u32 2147483648, %v1535_v56 }
  0x9f   :  { %1076 = vrsqrt.f32 %v1539_v63  ;;  %v1065_v6 = vpop.eup %1064  ;;  %v429_v10 = vsel %vm428_vm2, %v176_v50, %v427_v62  ;;  %v544_v27 = vsel %vm542_vm1, %v543_v61, %v541_v7  ;;  %vm526_vm0 = vcmp.eq.f32.partialorder %v1539_v63, inf }
  0xa0   :  { %1078 = vrsqrt.f32 %v1541_v3  ;;  %v1067_v14 = vpop.eup %1066  ;;  %v432_v15 = vsel %vm430_vm3, %v431_v4, %v429_v10  ;;  %v420_v18 = vmul.f32 %v1065_v6, %v174_v51  ;;  %v592_v41 = vmax.f32 %v544_v27, 1e-12 }
  0xa1   :  { %v315_v19 = vmul.f32 %v1067_v14, %v144_v52  ;;  %v1547_v23 = vpop.xlane.xlu1 %201  ;;  %v576_v34 = vmax.f32 %v432_v15, 1e-12  ;;  %vm528_vm1 = vcmp.eq.f32.partialorder %v1539_v63, 0.0  ;;  %v529_v4 = vand.u32 2147483648, %v1539_v63 }
  0xa2   :  { %v1549_v26 = vpop.xlane.xlu0 %137  ;;  %v422_v30 = vsel %vm421_vm4, %v174_v51, %v420_v18  ;;  %1080 = vrsqrt.f32 %v1547_v23  ;;  %vm407_vm2 = vcmp.eq.f32.partialorder %v1541_v3, inf  ;;  %vm409_vm3 = vcmp.eq.f32.partialorder %v1541_v3, 0.0 }
  0xa3   :  { %v1069_v33 = vpop.eup %1068  ;;  %v425_v35 = vsel %vm423_vm5, %v424_v11, %v422_v30  ;;  %v317_v36 = vsel %vm316_vm6, %v144_v52, %v315_v19  ;;  %1082 = vrsqrt.f32 %v1549_v26  ;;  %vm519_vm4 = vcmp.eq.f32.partialorder %v1547_v23, inf }
  0xa4   :  { %v1071_v37 = vpop.eup %1070  ;;  %v320_v38 = vsel %vm318_vm7, %v319_v22, %v317_v36  ;;  %v532_v39 = vmul.f32 %v1069_v33, %v1527_v53  ;;  %v575_v45 = vmax.f32 %v425_v35, 1e-12  ;;  %1084 = vrcp.f32 %v576_v34 }
  0xa5   :  { %v308_v42 = vmul.f32 %v1071_v37, %v1529_v54  ;;  %v1570_v44 = vpop.xlane.xlu1 %135  ;;  %v560_v49 = vmax.f32 %v320_v38, 1e-12  ;;  %vm521_vm5 = vcmp.eq.f32.partialorder %v1547_v23, 0.0  ;;  %vm295_vm6 = vcmp.eq.f32.partialorder %v1549_v26, inf }
  0xa6   :  { %v1568_v43 = vpop.xlane.xlu0 %167  ;;  %v534_v46 = vsel %vm533_vm8, %v1527_v53, %v532_v39  ;;  %vm297_vm7 = vcmp.eq.f32.partialorder %v1549_v26, 0.0  ;;  %v298_v35 = vand.u32 2147483648, %v1549_v26 }
  0xa7   :  { %v537_v51 = vsel %vm535_vm9, %v536_v31, %v534_v46  ;;  %v310_v52 = vsel %vm309_vm10, %v1529_v54, %v308_v42  ;;  %1086 = vrsqrt.f32 %v1568_v43  ;;  %v410_v54 = vand.u32 2147483648, %v1541_v3 }
  0xa8   :  { %v1073_v48 = vpop.eup %1072  ;;  %1088 = vrcp.f32 %v592_v41  ;;  %v591_v7 = vmax.f32 %v537_v51, 1e-12  ;;  %v313_v10 = vsel %vm311_vm11, %v312_v40, %v310_v52  ;;  %v522_v31 = vand.u32 2147483648, %v1547_v23 }
  0xa9   :  { %v1075_v50 = vpop.eup %1074  ;;  %v413_v57 = vmul.f32 %v1073_v48, %v1533_v55  ;;  %v1591_v62 = vpop.xlane.xlu1 %165  ;;  %1090 = vrcp.f32 %v575_v45  ;;  %v559_v27 = vmax.f32 %v313_v10, 1e-12  ;;  %vm400_vm8 = vcmp.eq.f32.partialorder %v1568_v43, inf }
  0xaa   :  { %v301_v59 = vmul.f32 %v1075_v50, %v1535_v56  ;;  %v1589_v61 = vpop.xlane.xlu0 %199  ;;  %1092 = vrcp.f32 %v560_v49  ;;  %vm402_vm9 = vcmp.eq.f32.partialorder %v1568_v43, 0.0  ;;  %v403_v45 = vand.u32 2147483648, %v1568_v43 }
  0xab   :  { %v415_v53 = vsel %vm414_vm12, %v1533_v55, %v413_v57  ;;  %1094 = vrsqrt.f32 %v1570_v44  ;;  %vm288_vm10 = vcmp.eq.f32.partialorder %v1570_v44, inf  ;;  %vm290_vm11 = vcmp.eq.f32.partialorder %v1570_v44, 0.0 }
  0xac   :  { %v1077_v6 = vpop.eup %1076  ;;  %v418_v14 = vsel %vm416_vm13, %v417_v47, %v415_v53  ;;  %v303_v15 = vsel %vm302_vm14, %v1535_v56, %v301_v59  ;;  %1096 = vrsqrt.f32 %v1589_v61  ;;  %v291_v48 = vand.u32 2147483648, %v1570_v44 }
  0xad   :  { %v1079_v11 = vpop.eup %1078  ;;  %v525_v18 = vmul.f32 %v1077_v6, %v1539_v63  ;;  %v1612_v22 = vpop.xlane.xlu1 %197  ;;  %1098 = vrcp.f32 %v591_v7  ;;  %v574_v32 = vmax.f32 %v418_v14, 1e-12  ;;  %v306_v33 = vsel %vm304_vm15, %v305_v60, %v303_v15 }
  0xae   :  { %v406_v19 = vmul.f32 %v1079_v11, %v1541_v3  ;;  %v1614_v55 = vpop.xlane.xlu0 %133  ;;  %1100 = vrsqrt.f32 %v1591_v62  ;;  %v558_v40 = vmax.f32 %v306_v33, 1e-12  ;;  %vm512_vm12 = vcmp.eq.f32.partialorder %v1589_v61, inf }
  0xaf   :  { %v527_v30 = vsel %vm526_vm0, %v1539_v63, %v525_v18  ;;  %v1081_v36 = vpop.eup %1080  ;;  %1102 = vrsqrt.f32 %v1612_v22  ;;  %vm514_vm13 = vcmp.eq.f32.partialorder %v1589_v61, 0.0  ;;  %vm393_vm14 = vcmp.eq.f32.partialorder %v1591_v62, inf }
  0xb0   :  { %v408_v34 = vsel %vm407_vm2, %v1541_v3, %v406_v19  ;;  %v530_v37 = vsel %vm528_vm1, %v529_v4, %v527_v30  ;;  %v1083_v39 = vpop.eup %1082  ;;  %1104 = vrcp.f32 %v559_v27  ;;  %v518_v42 = vmul.f32 %v1081_v36, %v1547_v23 }
  0xb1   :  { %v1638_v38 = vpop.xlane.xlu1 %131  ;;  %v411_v41 = vsel %vm409_vm3, %v410_v54, %v408_v34  ;;  %1106 = vrcp.f32 %v574_v32  ;;  %v294_v63 = vmul.f32 %v1083_v39, %v1549_v26  ;;  %v1085_v46 = vpop.eup %1084  ;;  %v590_v47 = vmax.f32 %v530_v37, 1e-12 }
  0xb2   :  { %v1636_v56 = vpop.xlane.xlu0 %163  ;;  %1108 = vrsqrt.f32 %v1614_v55  ;;  %v573_v3 = vmax.f32 %v411_v41, 1e-12  ;;  %v520_v50 = vsel %vm519_vm4, %v1547_v23, %v518_v42  ;;  %v515_v4 = vand.u32 2147483648, %v1589_v61 }
  0xb3   :  { %1110 = vrsqrt.f32 %v1636_v56  ;;  %v296_v59 = vsel %vm295_vm6, %v1549_v26, %v294_v63  ;;  %v396_v6 = vand.u32 2147483648, %v1591_v62  ;;  %v523_v10 = vsel %vm521_vm5, %v522_v31, %v520_v50 }
  0xb4   :  { %v1087_v49 = vpop.eup %1086  ;;  %1112 = vrcp.f32 %v558_v40  ;;  %vm395_vm15 = vcmp.eq.f32.partialorder %v1591_v62, 0.0  ;;  %vm505_vm0 = vcmp.eq.f32.partialorder %v1612_v22, inf  ;;  %v720_v14 = vmul.f32 %v1085_v46, %v1326_v1 }
  0xb5   :  { %v1656_v52 = vpop.xlane.xlu1 %161  ;;  %v1089_v57 = vpop.eup %1088  ;;  %v399_v60 = vmul.f32 %v1087_v49, %v1568_v43  ;;  %1114 = vrsqrt.f32 %v1638_v38  ;;  %v299_v18 = vsel %vm297_vm7, %v298_v35, %v296_v59  ;;  %vm507_vm1 = vcmp.eq.f32.partialorder %v1612_v22, 0.0 }
  0xb6   :  { %v1654_v51 = vpop.xlane.xlu0 %195  ;;  %v1091_v53 = vpop.eup %1090  ;;  %1116 = vrcp.f32 %v590_v47  ;;  %v736_v23 = vmul.f32 %v1089_v57, %v1321_v0  ;;  %v508_v1 = vand.u32 2147483648, %v1612_v22  ;;  %970 = vmatprep.subr.mxu0 %v720_v14  ;;  %941 = vst [vmem:[%s2400_s5 + $0xf8] sm:$0xff] %v720_v14  ;;  %v589_v26 = vmax.f32 %v523_v10, 1e-12 }
  0xb7   :  { %v1093_v7 = vpop.eup %1092  ;;  %v401_v11 = vsel %vm400_vm8, %v1568_v43, %v399_v60  ;;  %1118 = vrcp.f32 %v573_v3  ;;  %vm281_vm2 = vcmp.eq.f32.partialorder %v1614_v55, inf  ;;  %v557_v32 = vmax.f32 %v299_v18, 1e-12 }
  0xb8   :  { %v1095_v15 = vpop.eup %1094  ;;  %v404_v19 = vsel %vm402_vm9, %v403_v45, %v401_v11  ;;  %1120 = vrsqrt.f32 %v1654_v51  ;;  %1022 = vmatpush3.xpose.msra.mxu1 %v736_v23  ;;  %957 = vst [vmem:[%s2400_s5 + $0x178] sm:$0xff] %v736_v23  ;;  %vm283_vm3 = vcmp.eq.f32.partialorder %v1614_v55, 0.0  ;;  %v704_v39 = vmul.f32 %v1093_v7, %v1340_v5 }
  0xb9   :  { %v1680_v54 = vpop.xlane.xlu1 %193  ;;  %v1097_v30 = vpop.eup %1096  ;;  %v287_v31 = vmul.f32 %v1095_v15, %v1570_v44  ;;  %1122 = vrsqrt.f32 %v1656_v52  ;;  %v572_v33 = vmax.f32 %v404_v19, 1e-12  ;;  %1023 = vmatprep.subr.mxu1 %v1285_v58  ;;  %v719_v40 = vmul.f32 %v1091_v53, %v1331_v2 }
  0xba   :  { %v1682_v27 = vpop.xlane.xlu0 %129  ;;  %v511_v0 = vmul.f32 %v1097_v30, %v1589_v61  ;;  %v1099_v43 = vpop.eup %1098  ;;  %1124 = vrsqrt.f32 %v1680_v54  ;;  %vm386_vm4 = vcmp.eq.f32.partialorder %v1636_v56, inf  ;;  %971 = vmatpush3.xpose.msra.mxu0 %v704_v39  ;;  %925 = vst [vmem:[%s2400_s5 + $0x78] sm:$0xff] %v704_v39  ;;  %vm388_vm5 = vcmp.eq.f32.partialorder %v1636_v56, 0.0 }
  0xbb   :  { %v289_v34 = vsel %vm288_vm10, %v1570_v44, %v287_v31  ;;  %v1101_v35 = vpop.eup %1100  ;;  %v284_v44 = vand.u32 2147483648, %v1614_v55  ;;  %1126 = vrcp.f32 %v589_v26  ;;  %940 = vst [vmem:[%s2400_s5 + $0xf0] sm:$0xff] %v719_v40  ;;  %972 = vmatprep.subr.mxu0 %v719_v40  ;;  %v389_v59 = vand.u32 2147483648, %v1636_v56 }
  0xbc   :  { %v292_v36 = vsel %vm290_vm11, %v291_v48, %v289_v34  ;;  %v513_v37 = vsel %vm512_vm12, %v1589_v61, %v511_v0  ;;  %v1103_v63 = vpop.eup %1102  ;;  %v392_v46 = vmul.f32 %v1101_v35, %v1591_v62  ;;  %1128 = vrcp.f32 %v557_v32 }
  0xbd   :  { %v1711_v42 = vpop.xlane.xlu1 %127  ;;  %v516_v45 = vsel %vm514_vm13, %v515_v4, %v513_v37  ;;  %v1105_v47 = vpop.eup %1104  ;;  %v556_v48 = vmax.f32 %v292_v36, 1e-12  ;;  %v504_v5 = vmul.f32 %v1103_v63, %v1612_v22  ;;  %1130 = vrcp.f32 %v572_v33 }
  0xbe   :  { %v1709_v41 = vpop.xlane.xlu0 %159  ;;  %v1726_v2 = vpop.eup %1106  ;;  %v588_v61 = vmax.f32 %v516_v45, 1e-12  ;;  %v394_v49 = vsel %vm393_vm14, %v1591_v62, %v392_v46  ;;  %vm274_vm6 = vcmp.eq.f32.partialorder %v1638_v38, inf  ;;  %1132 = vrsqrt.f32 %v1682_v27 }
  0xbf   :  { %v1109_v3 = vpop.eup %1108  ;;  %v397_v50 = vsel %vm395_vm15, %v396_v6, %v394_v49  ;;  %v506_v57 = vsel %vm505_vm0, %v1612_v22, %v504_v5  ;;  %1134 = vrcp.f32 %v556_v48  ;;  %vm276_vm7 = vcmp.eq.f32.partialorder %v1638_v38, 0.0 }
  0xc0   :  { %v1111_v4 = vpop.eup %1110  ;;  %v509_v7 = vsel %vm507_vm1, %v508_v1, %v506_v57  ;;  %v280_v10 = vmul.f32 %v1109_v3, %v1614_v55  ;;  %v703_v11 = vmul.f32 %v1105_v47, %v1354_v9  ;;  %1136 = vrcp.f32 %v588_v61 }
  0xc1   :  { %v1742_v53 = vpop.xlane.xlu1 %157  ;;  %v1113_v62 = vpop.eup %1112  ;;  %v385_v6 = vmul.f32 %v1111_v4, %v1636_v56  ;;  %v571_v15 = vmax.f32 %v397_v50, 1e-12  ;;  %v735_v18 = vmul.f32 %v1099_v43, %v1349_v8  ;;  %v587_v23 = vmax.f32 %v509_v7, 1e-12 }
  0xc2   :  { %v1740_v60 = vpop.xlane.xlu0 %191  ;;  %v1115_v14 = vpop.eup %1114  ;;  %v282_v22 = vsel %vm281_vm2, %v1614_v55, %v280_v10  ;;  %973 = vmatpush3.xpose.msra.mxu0 %v703_v11  ;;  %924 = vst [vmem:[%s2400_s5 + $0x70] sm:$0xff] %v703_v11  ;;  %v277_v0 = vand.u32 2147483648, %v1638_v38  ;;  %vm498_vm8 = vcmp.eq.f32.partialorder %v1654_v51, inf  ;;  %vm500_vm9 = vcmp.eq.f32.partialorder %v1654_v51, 0.0 }
  0xc3   :  { %v1756_v19 = vpop.eup %1116  ;;  %v285_v30 = vsel %vm283_vm3, %v284_v44, %v282_v22  ;;  %v387_v31 = vsel %vm386_vm4, %v1636_v56, %v385_v6  ;;  %v273_v9 = vmul.f32 %v1115_v14, %v1638_v38  ;;  %1024 = vmatpush3.xpose.msra.mxu1 %v735_v18  ;;  %956 = vst [vmem:[%s2400_s5 + $0x170] sm:$0xff] %v735_v18  ;;  %1138 = vrsqrt.f32 %v1709_v41 }
  0xc4   :  { %v1119_v26 = vpop.eup %1118  ;;  %v555_v43 = vmax.f32 %v285_v30, 1e-12  ;;  %v390_v32 = vsel %vm388_vm5, %v389_v59, %v387_v31  ;;  %v501_v33 = vand.u32 2147483648, %v1654_v51  ;;  %1140 = vrsqrt.f32 %v1711_v42  ;;  %1025 = vmatprep.subr.mxu1 %v1285_v58 }
  0xc5   :  { %v1767_v1 = vpop.xlane.xlu1 %189  ;;  %v1121_v55 = vpop.eup %1120  ;;  %1142 = vrcp.f32 %v571_v15  ;;  %v275_v35 = vsel %vm274_vm6, %v1638_v38, %v273_v9  ;;  %vm379_vm10 = vcmp.eq.f32.partialorder %v1656_v52, inf  ;;  %vm381_vm11 = vcmp.eq.f32.partialorder %v1656_v52, 0.0 }
  0xc6   :  { %v1769_v8 = vpop.xlane.xlu0 %125  ;;  %v1123_v34 = vpop.eup %1122  ;;  %v497_v36 = vmul.f32 %v1121_v55, %v1654_v51  ;;  %1144 = vrcp.f32 %v587_v23  ;;  %v382_v37 = vand.u32 2147483648, %v1656_v52  ;;  %v570_v63 = vmax.f32 %v390_v32, 1e-12 }
  0xc7   :  { %v378_v56 = vmul.f32 %v1123_v34, %v1656_v52  ;;  %v718_v46 = vmul.f32 %v1726_v2, %v1363_v12  ;;  %v702_v44 = vmul.f32 %v1113_v62, %v1368_v13  ;;  %v1125_v47 = vpop.eup %1124  ;;  %1146 = vrcp.f32 %v555_v43 }
  0xc8   :  { %v499_v45 = vsel %vm498_vm8, %v1654_v51, %v497_v36  ;;  %v278_v48 = vsel %vm276_vm7, %v277_v0, %v275_v35  ;;  %vm491_vm12 = vcmp.eq.f32.partialorder %v1680_v54, inf  ;;  %vm493_vm13 = vcmp.eq.f32.partialorder %v1680_v54, 0.0  ;;  %v1127_v5 = vpop.eup %1126 }
  0xc9   :  { %v1793_v40 = vpop.xlane.xlu1 %123  ;;  %v502_v61 = vsel %vm500_vm9, %v501_v33, %v499_v45  ;;  %v380_v49 = vsel %vm379_vm10, %v1656_v52, %v378_v56  ;;  %v490_v12 = vmul.f32 %v1125_v47, %v1680_v54  ;;  %974 = vmatprep.subr.mxu0 %v718_v46  ;;  %939 = vst [vmem:[%s2400_s5 + $0xe8] sm:$0xff] %v718_v46  ;;  %923 = vst [vmem:[%s2400_s5 + $0x68] sm:$0xff] %v702_v44  ;;  %v1129_v13 = vpop.eup %1128 }
  0xca   :  { %v1791_v39 = vpop.xlane.xlu0 %155  ;;  %1148 = vrsqrt.f32 %v1740_v60  ;;  %v494_v38 = vand.u32 2147483648, %v1680_v54  ;;  %vm267_vm14 = vcmp.eq.f32.partialorder %v1682_v27, inf  ;;  %vm269_vm15 = vcmp.eq.f32.partialorder %v1682_v27, 0.0  ;;  %975 = vmatpush3.xpose.msra.mxu0 %v702_v44  ;;  %v1131_v51 = vpop.eup %1130 }
  0xcb   :  { %1150 = vrsqrt.f32 %v1742_v53  ;;  %v554_v2 = vmax.f32 %v278_v48, 1e-12  ;;  %v270_v3 = vand.u32 2147483648, %v1682_v27  ;;  %vm372_vm0 = vcmp.eq.f32.partialorder %v1709_v41, inf  ;;  %v1133_v57 = vpop.eup %1132 }
  0xcc   :  { %1152 = vrcp.f32 %v570_v63  ;;  %v586_v59 = vmax.f32 %v502_v61, 1e-12  ;;  %v383_v4 = vsel %vm381_vm11, %v382_v37, %v380_v49  ;;  %v492_v7 = vsel %vm491_vm12, %v1680_v54, %v490_v12  ;;  %v1135_v6 = vpop.eup %1134 }
  0xcd   :  { %v1824_v50 = vpop.xlane.xlu1 %153  ;;  %v717_v10 = vmul.f32 %v1119_v26, %v1382_v17  ;;  %v266_v11 = vmul.f32 %v1133_v57, %v1682_v27  ;;  %vm374_vm1 = vcmp.eq.f32.partialorder %v1709_v41, 0.0  ;;  %v734_v14 = vmul.f32 %v1756_v19, %v1377_v16  ;;  %v1839_v52 = vpop.eup %1136 }
  0xce   :  { %v1832_v62 = vpop.xlane.xlu0 %187  ;;  %1154 = vrsqrt.f32 %v1767_v1  ;;  %v375_v15 = vand.u32 2147483648, %v1709_v41  ;;  %vm260_vm2 = vcmp.eq.f32.partialorder %v1711_v42, inf  ;;  %v263_v17 = vand.u32 2147483648, %v1711_v42 }
  0xcf   :  { %976 = vmatprep.subr.mxu0 %v717_v10  ;;  %938 = vst [vmem:[%s2400_s5 + $0xe0] sm:$0xff] %v717_v10  ;;  %1156 = vrsqrt.f32 %v1769_v8  ;;  %v569_v22 = vmax.f32 %v383_v4, 1e-12  ;;  %v495_v16 = vsel %vm493_vm13, %v494_v38, %v492_v7  ;;  %v268_v18 = vsel %vm267_vm14, %v1682_v27, %v266_v11  ;;  %1026 = vmatpush3.xpose.msra.mxu1 %v734_v14 }
  0xd0   :  { %1158 = vrcp.f32 %v554_v2  ;;  %vm262_vm3 = vcmp.eq.f32.partialorder %v1711_v42, 0.0  ;;  %955 = vst [vmem:[%s2400_s5 + $0x168] sm:$0xff] %v734_v14  ;;  %v1139_v19 = vpop.eup %1138  ;;  %vm484_vm4 = vcmp.eq.f32.partialorder %v1740_v60, inf  ;;  %1027 = vmatprep.subr.mxu1 %v1285_v58  ;;  %v701_v54 = vmul.f32 %v1129_v13, %v1396_v21 }
  0xd1   :  { %1160 = vrcp.f32 %v586_v59  ;;  %v733_v23 = vmul.f32 %v1127_v5, %v1391_v20  ;;  %v1141_v30 = vpop.eup %1140  ;;  %v271_v31 = vsel %vm269_vm15, %v270_v3, %v268_v18  ;;  %v371_v9 = vmul.f32 %v1139_v19, %v1709_v41  ;;  %v1866_v26 = vpop.xlane.xlu1 %185 }
  0xd2   :  { %vm486_vm5 = vcmp.eq.f32.partialorder %v1740_v60, 0.0  ;;  %1162 = vrsqrt.f32 %v1791_v39  ;;  %v1143_v0 = vpop.eup %1142  ;;  %v585_v55 = vmax.f32 %v495_v16, 1e-12  ;;  %v259_v43 = vmul.f32 %v1141_v30, %v1711_v42  ;;  %977 = vmatpush3.xpose.msra.mxu0 %v701_v54  ;;  %922 = vst [vmem:[%s2400_s5 + $0x60] sm:$0xff] %v701_v54  ;;  %v1877_v20 = vpop.xlane.xlu0 %121  ;;  %v1252_v16 = vld [vmem:[%s2398_s1 + $0x50] sm:$0xff] }
  0xd3   :  { %v487_v21 = vand.u32 2147483648, %v1740_v60  ;;  %954 = vst [vmem:[%s2400_s5 + $0x160] sm:$0xff] %v733_v23  ;;  %1164 = vrsqrt.f32 %v1793_v40  ;;  %v1879_v27 = vpop.eup %1144  ;;  %v373_v32 = vsel %vm372_vm0, %v1709_v41, %v371_v9  ;;  %vm365_vm6 = vcmp.eq.f32.partialorder %v1742_v53, inf  ;;  %1028 = vmatpush3.xpose.msra.mxu1 %v733_v23  ;;  %v1253_v30 = vld [vmem:[%s2398_s1 + $0x150] sm:$0xff] }
  0xd4   :  { %1166 = vrcp.f32 %v569_v22  ;;  %vm367_vm7 = vcmp.eq.f32.partialorder %v1742_v53, 0.0  ;;  %v553_v33 = vmax.f32 %v271_v31, 1e-12  ;;  %v368_v34 = vand.u32 2147483648, %v1742_v53  ;;  %1029 = vmatprep.subr.mxu1 %v1285_v58  ;;  %v1890_v36 = vpop.eup %1146 }
  0xd5   :  { %vm477_vm8 = vcmp.eq.f32.partialorder %v1767_v1, inf  ;;  %v716_v35 = vmul.f32 %v1131_v51, %v1405_v24  ;;  %v261_v56 = vsel %vm260_vm2, %v1711_v42, %v259_v43  ;;  %vm479_vm9 = vcmp.eq.f32.partialorder %v1767_v1, 0.0  ;;  %v1912_v41 = vpop.xlane.xlu1 %119 }
  0xd6   :  { %v700_v37 = vmul.f32 %v1135_v6, %v1410_v25  ;;  %1168 = vrsqrt.f32 %v1832_v62  ;;  %v376_v45 = vsel %vm374_vm1, %v375_v15, %v373_v32  ;;  %v480_v24 = vand.u32 2147483648, %v1767_v1  ;;  %v1923_v12 = vpop.xlane.xlu0 %151 }
  0xd7   :  { %v1149_v63 = vpop.eup %1148  ;;  %1170 = vrcp.f32 %v585_v55  ;;  %vm253_vm10 = vcmp.eq.f32.partialorder %v1769_v8, inf  ;;  %978 = vmatprep.subr.mxu0 %v716_v35  ;;  %937 = vst [vmem:[%s2400_s5 + $0xd8] sm:$0xff] %v716_v35  ;;  %vm255_vm11 = vcmp.eq.f32.partialorder %v1769_v8, 0.0  ;;  %v256_v25 = vand.u32 2147483648, %v1769_v8 }
  0xd8   :  { %v1151_v46 = vpop.eup %1150  ;;  %v483_v44 = vmul.f32 %v1149_v63, %v1740_v60  ;;  %v361_v47 = vand.u32 2147483648, %v1791_v39  ;;  %979 = vmatpush3.xpose.msra.mxu0 %v700_v37  ;;  %921 = vst [vmem:[%s2400_s5 + $0x58] sm:$0xff] %v700_v37  ;;  %1172 = vrcp.f32 %v553_v33  ;;  %v264_v5 = vsel %vm262_vm3, %v263_v17, %v261_v56  ;;  %v1254_v63 = vld [vmem:[%s2398_s1 + $0xc8] sm:$0xff] }
  0xd9   :  { %v1914_v48 = vpop.eup %1152  ;;  %v364_v61 = vmul.f32 %v1151_v46, %v1742_v53  ;;  %vm358_vm12 = vcmp.eq.f32.partialorder %v1791_v39, inf  ;;  %v715_v49 = vmul.f32 %v1143_v0, %v1424_v29  ;;  %v568_v13 = vmax.f32 %v376_v45, 1e-12  ;;  %v1963_v14 = vpop.xlane.xlu1 %149 }
  0xda   :  { %v485_v38 = vsel %vm484_vm4, %v1740_v60, %v483_v44  ;;  %vm360_vm13 = vcmp.eq.f32.partialorder %v1791_v39, 0.0  ;;  %1174 = vrsqrt.f32 %v1824_v50  ;;  %v732_v42 = vmul.f32 %v1839_v52, %v1419_v28  ;;  %v1974_v19 = vpop.xlane.xlu0 %183 }
  0xdb   :  { %v1155_v51 = vpop.eup %1154  ;;  %v488_v2 = vsel %vm486_vm5, %v487_v21, %v485_v38  ;;  %v366_v29 = vsel %vm365_vm6, %v1742_v53, %v364_v61  ;;  %vm246_vm14 = vcmp.eq.f32.partialorder %v1793_v40, inf  ;;  %980 = vmatprep.subr.mxu0 %v715_v49  ;;  %936 = vst [vmem:[%s2400_s5 + $0xd0] sm:$0xff] %v715_v49  ;;  %1176 = vrsqrt.f32 %v1866_v26 }
  0xdc   :  { %v1157_v3 = vpop.eup %1156  ;;  %v552_v57 = vmax.f32 %v264_v5, 1e-12  ;;  %v369_v28 = vsel %vm367_vm7, %v368_v34, %v366_v29  ;;  %v476_v60 = vmul.f32 %v1155_v51, %v1767_v1  ;;  %vm248_vm15 = vcmp.eq.f32.partialorder %v1793_v40, 0.0  ;;  %1030 = vmatpush3.xpose.msra.mxu1 %v732_v42  ;;  %953 = vst [vmem:[%s2400_s5 + $0x158] sm:$0xff] %v732_v42 }
  0xdd   :  { %v1949_v59 = vpop.eup %1158  ;;  %v252_v4 = vmul.f32 %v1157_v3, %v1769_v8  ;;  %v249_v7 = vand.u32 2147483648, %v1793_v40  ;;  %vm470_vm0 = vcmp.eq.f32.partialorder %v1832_v62, inf  ;;  %1031 = vmatprep.subr.mxu1 %v1285_v58  ;;  %1178 = vrsqrt.f32 %v1877_v20  ;;  %v1257_v3 = vld [vmem:[%s2398_s1 + $0x148] sm:$0xff] }
  0xde   :  { %v1956_v53 = vpop.eup %1160  ;;  %1180 = vrcp.f32 %v568_v13  ;;  %v584_v10 = vmax.f32 %v488_v2, 1e-12  ;;  %v478_v6 = vsel %vm477_vm8, %v1767_v1, %v476_v60  ;;  %vm472_vm1 = vcmp.eq.f32.partialorder %v1832_v62, 0.0  ;;  %v1256_v2 = vld [vmem:[%s2398_s1 + $0xc0] sm:$0xff] }
  0xdf   :  { %v473_v11 = vand.u32 2147483648, %v1832_v62  ;;  %v1163_v52 = vpop.eup %1162  ;;  %v567_v15 = vmax.f32 %v369_v28, 1e-12  ;;  %v481_v17 = vsel %vm479_vm9, %v480_v24, %v478_v6  ;;  %v254_v22 = vsel %vm253_vm10, %v1769_v8, %v252_v4  ;;  %v2020_v24 = vpop.xlane.xlu0 %117 }
  0xe0   :  { %v699_v18 = vmul.f32 %v1252_v16, %v1890_v36  ;;  %v1165_v54 = vpop.eup %1164  ;;  %1182 = vrcp.f32 %v552_v57  ;;  %v257_v23 = vsel %vm255_vm11, %v256_v25, %v254_v22  ;;  %v357_v1 = vmul.f32 %v1163_v52, %v1791_v39  ;;  %v1255_v25 = vld [vmem:[%s2398_s1 + $0x48] sm:$0xff] }
  0xe1   :  { %v731_v31 = vmul.f32 %v1253_v30, %v1879_v27  ;;  %v1167_v9 = vpop.eup %1166  ;;  %v583_v0 = vmax.f32 %v481_v17, 1e-12  ;;  %v245_v55 = vmul.f32 %v1165_v54, %v1793_v40  ;;  %vm351_vm2 = vcmp.eq.f32.partialorder %v1824_v50, inf  ;;  %v1259_v30 = vld [vmem:[%s2398_s1 + $0x140] sm:$0xff] }
  0xe2   :  { %981 = vmatpush3.xpose.msra.mxu0 %v699_v18  ;;  %920 = vst [vmem:[%s2400_s5 + $0x50] sm:$0xff] %v699_v18  ;;  %1184 = vrsqrt.f32 %v1923_v12  ;;  %v551_v8 = vmax.f32 %v257_v23, 1e-12  ;;  %v359_v43 = vsel %vm358_vm12, %v1791_v39, %v357_v1  ;;  %vm353_vm3 = vcmp.eq.f32.partialorder %v1824_v50, 0.0  ;;  %v2012_v39 = vpop.xlane.xlu1 %181 }
  0xe3   :  { %1186 = vrcp.f32 %v584_v10  ;;  %v354_v21 = vand.u32 2147483648, %v1824_v50  ;;  %1032 = vmatpush3.xpose.msra.mxu1 %v731_v31  ;;  %952 = vst [vmem:[%s2400_s5 + $0x150] sm:$0xff] %v731_v31  ;;  %v1169_v27 = vpop.eup %1168  ;;  %v362_v32 = vsel %vm360_vm13, %v361_v47, %v359_v43  ;;  %v247_v33 = vsel %vm246_vm14, %v1793_v40, %v245_v55  ;;  %v2067_v10 = vpop.xlane.xlu0 %147 }
  0xe4   :  { %1188 = vrcp.f32 %v567_v15  ;;  %vm463_vm4 = vcmp.eq.f32.partialorder %v1866_v26, inf  ;;  %1033 = vmatprep.subr.mxu1 %v1285_v58  ;;  %v2006_v34 = vpop.eup %1170  ;;  %v566_v35 = vmax.f32 %v362_v32, 1e-12  ;;  %v250_v36 = vsel %vm248_vm15, %v249_v7, %v247_v33 }
  0xe5   :  { %v469_v56 = vmul.f32 %v1169_v27, %v1832_v62  ;;  %1190 = vrsqrt.f32 %v1912_v41  ;;  %vm465_vm5 = vcmp.eq.f32.partialorder %v1866_v26, 0.0  ;;  %v466_v37 = vand.u32 2147483648, %v1866_v26  ;;  %v2022_v40 = vpop.eup %1172 }
  0xe6   :  { %1192 = vrcp.f32 %v583_v0  ;;  %v714_v45 = vmul.f32 %v1254_v63, %v1914_v48  ;;  %v550_v46 = vmax.f32 %v250_v36, 1e-12  ;;  %v698_v47 = vmul.f32 %v1255_v25, %v1949_v59  ;;  %v2058_v28 = vpop.xlane.xlu1 %115  ;;  %v1261_v63 = vld [vmem:[%s2398_s1 + $0x38] sm:$0xff] }
  0xe7   :  { %1194 = vrcp.f32 %v551_v8  ;;  %v471_v44 = vsel %vm470_vm0, %v1832_v62, %v469_v56  ;;  %v1175_v5 = vpop.eup %1174  ;;  %vm239_vm6 = vcmp.eq.f32.partialorder %v1877_v20, inf  ;;  %vm241_vm7 = vcmp.eq.f32.partialorder %v1877_v20, 0.0  ;;  %v2109_v43 = vpop.xlane.xlu0 %179 }
  0xe8   :  { %1196 = vrcp.f32 %v566_v35  ;;  %v474_v48 = vsel %vm472_vm1, %v473_v11, %v471_v44  ;;  %982 = vmatprep.subr.mxu0 %v714_v45  ;;  %935 = vst [vmem:[%s2400_s5 + $0xc8] sm:$0xff] %v714_v45  ;;  %v1177_v61 = vpop.eup %1176  ;;  %v350_v13 = vmul.f32 %v1175_v5, %v1824_v50  ;;  %v242_v38 = vand.u32 2147483648, %v1877_v20  ;;  %919 = vst [vmem:[%s2400_s5 + $0x48] sm:$0xff] %v698_v47  ;;  %v1260_v35 = vld [vmem:[%s2398_s1 + $0xb8] sm:$0xff] }
  0xe9   :  { %v582_v49 = vmax.f32 %v474_v48, 1e-12  ;;  %983 = vmatpush3.xpose.msra.mxu0 %v698_v47  ;;  %1198 = vrsqrt.f32 %v1974_v19  ;;  %v462_v62 = vmul.f32 %v1177_v61, %v1866_v26  ;;  %vm344_vm8 = vcmp.eq.f32.partialorder %v1923_v12, inf }
  0xea   :  { %vm346_vm9 = vcmp.eq.f32.partialorder %v1923_v12, 0.0  ;;  %1200 = vrsqrt.f32 %v1963_v14  ;;  %v1179_v42 = vpop.eup %1178  ;;  %v352_v51 = vsel %vm351_vm2, %v1824_v50, %v350_v13  ;;  %v713_v29 = vmul.f32 %v1256_v2, %v1167_v9  ;;  %v2102_v9 = vpop.xlane.xlu1 %145  ;;  %v1262_v13 = vld [vmem:[%s2398_s1 + $0xb0] sm:$0xff]  ;;  %v1263_v2 = vld [vmem:[%s2398_s1 + $0x138] sm:$0xff] }
  0xeb   :  { %1202 = vrcp.f32 %v550_v46  ;;  %v730_v57 = vmul.f32 %v1257_v3, %v1956_v53  ;;  %v1181_v60 = vpop.eup %1180  ;;  %v355_v59 = vsel %vm353_vm3, %v354_v21, %v352_v51  ;;  %v464_v4 = vsel %vm463_vm4, %v1866_v26, %v462_v62  ;;  %v2172_v3 = vpop.xlane.xlu0 %113 }
  0xec   :  { %v238_v7 = vmul.f32 %v1179_v42, %v1877_v20  ;;  %1204 = vrsqrt.f32 %v2012_v39  ;;  %v565_v6 = vmax.f32 %v355_v59, 1e-12  ;;  %v467_v53 = vsel %vm465_vm5, %v466_v37, %v464_v4  ;;  %984 = vmatprep.subr.mxu0 %v713_v29  ;;  %934 = vst [vmem:[%s2400_s5 + $0xc0] sm:$0xff] %v713_v29 }
  0xed   :  { %1206 = vrcp.f32 %v582_v49  ;;  %v347_v11 = vand.u32 2147483648, %v1923_v12  ;;  %1034 = vmatpush3.xpose.msra.mxu1 %v730_v57  ;;  %951 = vst [vmem:[%s2400_s5 + $0x148] sm:$0xff] %v730_v57  ;;  %v1183_v50 = vpop.eup %1182  ;;  %v581_v52 = vmax.f32 %v467_v53, 1e-12  ;;  %vm232_vm10 = vcmp.eq.f32.partialorder %v1912_v41, inf }
  0xee   :  { %v240_v15 = vsel %vm239_vm6, %v1877_v20, %v238_v7  ;;  %1035 = vmatprep.subr.mxu1 %v1285_v58  ;;  %1208 = vrsqrt.f32 %v2020_v24  ;;  %vm234_vm11 = vcmp.eq.f32.partialorder %v1912_v41, 0.0  ;;  %v235_v22 = vand.u32 2147483648, %v1912_v41  ;;  %v1258_v20 = vld [vmem:[%s2398_s1 + $0x40] sm:$0xff] }
  0xef   :  { %v1185_v26 = vpop.eup %1184  ;;  %1210 = vrcp.f32 %v565_v6  ;;  %v243_v17 = vsel %vm241_vm7, %v242_v38, %v240_v15  ;;  %vm456_vm12 = vcmp.eq.f32.partialorder %v1974_v19, inf  ;;  %vm458_vm13 = vcmp.eq.f32.partialorder %v1974_v19, 0.0 }
  0xf0   :  { %v2088_v16 = vpop.eup %1186  ;;  %1212 = vrcp.f32 %v581_v52  ;;  %v549_v18 = vmax.f32 %v243_v17, 1e-12  ;;  %v343_v54 = vmul.f32 %v1185_v26, %v1923_v12  ;;  %v697_v1 = vmul.f32 %v1258_v20, %v2022_v40 }
  0xf1   :  { %v1189_v23 = vpop.eup %1188  ;;  %v729_v31 = vmul.f32 %v1259_v30, %v2006_v34  ;;  %1214 = vrsqrt.f32 %v2067_v10  ;;  %v459_v8 = vand.u32 2147483648, %v1974_v19  ;;  %vm337_vm14 = vcmp.eq.f32.partialorder %v1963_v14, inf }
  0xf2   :  { %v1191_v0 = vpop.eup %1190  ;;  %1216 = vrcp.f32 %v549_v18  ;;  %v345_v55 = vsel %vm344_vm8, %v1923_v12, %v343_v54  ;;  %vm339_vm15 = vcmp.eq.f32.partialorder %v1963_v14, 0.0  ;;  %985 = vmatpush3.xpose.msra.mxu0 %v697_v1  ;;  %918 = vst [vmem:[%s2400_s5 + $0x40] sm:$0xff] %v697_v1  ;;  %v340_v34 = vand.u32 2147483648, %v1963_v14  ;;  %v1265_v1 = vld [vmem:[%s2398_s1 + $0x130] sm:$0xff] }
  0xf3   :  { %v2111_v21 = vpop.eup %1192  ;;  %v348_v27 = vsel %vm346_vm9, %v347_v11, %v345_v55  ;;  %v231_v32 = vmul.f32 %v1191_v0, %v1912_v41  ;;  %1036 = vmatpush3.xpose.msra.mxu1 %v729_v31  ;;  %950 = vst [vmem:[%s2400_s5 + $0x140] sm:$0xff] %v729_v31  ;;  %1218 = vrsqrt.f32 %v2058_v28  ;;  %vm449_vm0 = vcmp.eq.f32.partialorder %v2012_v39, inf }
  0xf4   :  { %v2124_v33 = vpop.eup %1194  ;;  %v564_v12 = vmax.f32 %v348_v27, 1e-12  ;;  %v712_v36 = vmul.f32 %v1260_v35, %v1181_v60  ;;  %1037 = vmatprep.subr.mxu1 %v1285_v58  ;;  %vm451_vm1 = vcmp.eq.f32.partialorder %v2012_v39, 0.0  ;;  %v696_v45 = vmul.f32 %v1261_v63, %v1183_v50 }
  0xf5   :  { %v2132_v56 = vpop.eup %1196  ;;  %v233_v37 = vsel %vm232_vm10, %v1912_v41, %v231_v32  ;;  %1220 = vrsqrt.f32 %v2109_v43  ;;  %v452_v44 = vand.u32 2147483648, %v2012_v39  ;;  %vm225_vm2 = vcmp.eq.f32.partialorder %v2020_v24, inf  ;;  %v2155_v41 = vpop.xlane.xlu1 %177 }
  0xf6   :  { %v1199_v40 = vpop.eup %1198  ;;  %1222 = vrcp.f32 %v564_v12  ;;  %v236_v46 = vsel %vm234_vm11, %v235_v22, %v233_v37  ;;  %986 = vmatprep.subr.mxu0 %v712_v36  ;;  %933 = vst [vmem:[%s2400_s5 + $0xb8] sm:$0xff] %v712_v36  ;;  %vm227_vm3 = vcmp.eq.f32.partialorder %v2020_v24, 0.0  ;;  %917 = vst [vmem:[%s2400_s5 + $0x38] sm:$0xff] %v696_v45  ;;  %v228_v49 = vand.u32 2147483648, %v2020_v24  ;;  %v1269_v36 = vld [vmem:[%s2398_s1 + $0x128] sm:$0xff] }
  0xf7   :  { %v1201_v25 = vpop.eup %1200  ;;  %v548_v47 = vmax.f32 %v236_v46, 1e-12  ;;  %v455_v5 = vmul.f32 %v1199_v40, %v1974_v19  ;;  %987 = vmatpush3.xpose.msra.mxu0 %v696_v45  ;;  %1224 = vrsqrt.f32 %v2102_v9  ;;  %vm330_vm4 = vcmp.eq.f32.partialorder %v2067_v10, inf }
  0xf8   :  { %v1203_v48 = vpop.eup %1202  ;;  %v336_v61 = vmul.f32 %v1201_v25, %v1963_v14  ;;  %v711_v38 = vmul.f32 %v1262_v13, %v1189_v23  ;;  %vm332_vm5 = vcmp.eq.f32.partialorder %v2067_v10, 0.0  ;;  %v333_v51 = vand.u32 2147483648, %v2067_v10  ;;  %v1264_v23 = vld [vmem:[%s2398_s1 + $0x30] sm:$0xff] }
  0xf9   :  { %v1205_v62 = vpop.eup %1204  ;;  %1226 = vrcp.f32 %v548_v47  ;;  %v457_v42 = vsel %vm456_vm12, %v1974_v19, %v455_v5  ;;  %v728_v29 = vmul.f32 %v1263_v2, %v2088_v16  ;;  %vm218_vm6 = vcmp.eq.f32.partialorder %v2058_v28, inf }
  0xfa   :  { %v1207_v57 = vpop.eup %1206  ;;  %v460_v60 = vsel %vm458_vm13, %v459_v8, %v457_v42  ;;  %v338_v59 = vsel %vm337_vm14, %v1963_v14, %v336_v61  ;;  %v448_v4 = vmul.f32 %v1205_v62, %v2012_v39  ;;  %988 = vmatprep.subr.mxu0 %v711_v38  ;;  %932 = vst [vmem:[%s2400_s5 + $0xb0] sm:$0xff] %v711_v38  ;;  %1228 = vrsqrt.f32 %v2155_v41  ;;  %v1267_v8 = vld [vmem:[%s2398_s1 + $0x28] sm:$0xff]  ;;  %v1272_v61 = vld [vmem:[%s2398_s1 + $0x98] sm:$0xff]  ;;  %v888_v62 = vld [vmem:[%s2401_s2] sm:$0xff] }
  0xfb   :  { %v1209_v7 = vpop.eup %1208  ;;  %v580_v6 = vmax.f32 %v460_v60, 1e-12  ;;  %v341_v53 = vsel %vm339_vm15, %v340_v34, %v338_v59  ;;  %vm220_vm7 = vcmp.eq.f32.partialorder %v2058_v28, 0.0  ;;  %1038 = vmatpush3.xpose.msra.mxu1 %v728_v29  ;;  %949 = vst [vmem:[%s2400_s5 + $0x138] sm:$0xff] %v728_v29  ;;  %1230 = vrsqrt.f32 %v2172_v3 }
  0xfc   :  { %v1211_v19 = vpop.eup %1210  ;;  %v563_v11 = vmax.f32 %v341_v53, 1e-12  ;;  %v450_v50 = vsel %vm449_vm0, %v2012_v39, %v448_v4  ;;  %v224_v52 = vmul.f32 %v1209_v7, %v2020_v24  ;;  %1039 = vmatprep.subr.mxu1 %v1285_v58  ;;  %v221_v26 = vand.u32 2147483648, %v2058_v28 }
  0xfd   :  { %v1213_v14 = vpop.eup %1212  ;;  %1232 = vrcp.f32 %v580_v6  ;;  %v453_v15 = vsel %vm451_vm1, %v452_v44, %v450_v50  ;;  %vm442_vm8 = vcmp.eq.f32.partialorder %v2109_v43, inf  ;;  %vm444_vm9 = vcmp.eq.f32.partialorder %v2109_v43, 0.0  ;;  %v1271_v44 = vld [vmem:[%s2398_s1 + $0x120] sm:$0xff] }
  0xfe   :  { %v1215_v17 = vpop.eup %1214  ;;  %1234 = vrcp.f32 %v563_v11  ;;  %v579_v22 = vmax.f32 %v453_v15, 1e-12  ;;  %v226_v16 = vsel %vm225_vm2, %v2020_v24, %v224_v52  ;;  %v695_v20 = vmul.f32 %v1264_v23, %v2124_v33  ;;  %v1266_v24 = vld [vmem:[%s2398_s1 + $0xa8] sm:$0xff]  ;;  %v1268_v33 = vld [vmem:[%s2398_s1 + $0xa0] sm:$0xff] }
  0xff   :  { %v1217_v18 = vpop.eup %1216  ;;  %v229_v54 = vsel %vm227_vm3, %v228_v49, %v226_v16  ;;  %v329_v39 = vmul.f32 %v1215_v17, %v2067_v10  ;;  %v727_v30 = vmul.f32 %v1265_v1, %v2111_v21  ;;  %v710_v55 = vmul.f32 %v1266_v24, %v2132_v56  ;;  %v1274_v17 = vld [vmem:[%s2398_s1 + $0x118] sm:$0xff] }
 0x100   :  { %v1219_v31 = vpop.eup %1218  ;;  %1236 = vrcp.f32 %v579_v22  ;;  %v547_v0 = vmax.f32 %v229_v54, 1e-12  ;;  %v694_v27 = vmul.f32 %v1267_v8, %v1203_v48  ;;  %989 = vmatpush3.xpose.msra.mxu0 %v695_v20  ;;  %916 = vst [vmem:[%s2400_s5 + $0x30] sm:$0xff] %v695_v20  ;;  %v709_v12 = vmul.f32 %v1268_v33, %v1211_v19 }
 0x101   :  { %v331_v32 = vsel %vm330_vm4, %v2067_v10, %v329_v39  ;;  %v217_v21 = vmul.f32 %v1219_v31, %v2058_v28  ;;  %1040 = vmatpush3.xpose.msra.mxu1 %v727_v30  ;;  %948 = vst [vmem:[%s2400_s5 + $0x130] sm:$0xff] %v727_v30  ;;  %990 = vmatprep.subr.mxu0 %v710_v55  ;;  %931 = vst [vmem:[%s2400_s5 + $0xa8] sm:$0xff] %v710_v55  ;;  %v1270_v10 = vld [vmem:[%s2398_s1 + $0x20] sm:$0xff]  ;;  %vm1286_vm10 = vmmov 0   ;;  %v445_v48 = vand.u32 2147483648, %v2109_v43  ;;  %v1277_v31 = vld [vmem:[%s2398_s1 + $0x10] sm:$0xff] }
 0x102   :  { %v1221_v34 = vpop.eup %1220  ;;  %1238 = vrcp.f32 %v547_v0  ;;  %v334_v35 = vsel %vm332_vm5, %v333_v51, %v331_v32  ;;  %915 = vst [vmem:[%s2400_s5 + $0x28] sm:$0xff] %v694_v27  ;;  %1041 = vmatprep.subr.mxu1 %v1285_v58  ;;  %v726_v56 = vmul.f32 %v1269_v36, %v1207_v57  ;;  %v693_v37 = vmul.f32 %v1270_v10, %v1217_v18  ;;  %v1275_v18 = vld [vmem:[%s2398_s1 + $0x90] sm:$0xff]  ;;  %v1278_v55 = vld [vmem:[%s2398_s1 + $0x88] sm:$0xff]  ;;  %v1281_v36 = vld [vmem:[%s2398_s1 + $0x80] sm:$0xff] }
 0x103   :  { %v1223_v63 = vpop.eup %1222  ;;  %v562_v45 = vmax.f32 %v334_v35, 1e-12  ;;  %v219_v40 = vsel %vm218_vm6, %v2058_v28, %v217_v21  ;;  %v441_v46 = vmul.f32 %v1221_v34, %v2109_v43  ;;  %930 = vst [vmem:[%s2400_s5 + $0xa0] sm:$0xff] %v709_v12  ;;  %v725_v25 = vmul.f32 %v1271_v44, %v1213_v14  ;;  %1053 = vmatprep.mubr.msk.f32.mxu1 %vm1286_vm10, %v1285_v58  ;;  %v1279_v32 = vld [vmem:[%s2398_s1 + $0x8] sm:$0xff]  ;;  %v1284_v44 = vld [vmem:[%s2399_s0] sm:$0xff] }
 0x104   :  { %v1225_v47 = vpop.eup %1224  ;;  %v222_v5 = vsel %vm220_vm7, %v221_v26, %v219_v40  ;;  %947 = vst [vmem:[%s2400_s5 + $0x128] sm:$0xff] %v726_v56  ;;  %914 = vst [vmem:[%s2400_s5 + $0x20] sm:$0xff] %v693_v37  ;;  %v708_v49 = vmul.f32 %v1272_v61, %v1223_v63  ;;  %991 = vmatpush3.xpose.msra.mxu0 %v694_v27  ;;  %vm323_vm11 = vcmp.eq.f32.partialorder %v2102_v9, inf  ;;  %vm325_vm12 = vcmp.eq.f32.partialorder %v2102_v9, 0.0  ;;  %v1283_v40 = vld [vmem:[%s2398_s1] sm:$0xff] }
 0x105   :  { %1240 = vrcp.f32 %v562_v45  ;;  %v546_v13 = vmax.f32 %v222_v5, 1e-12  ;;  %v443_v28 = vsel %vm442_vm8, %v2109_v43, %v441_v46  ;;  %v322_v38 = vmul.f32 %v1225_v47, %v2102_v9  ;;  %1042 = vmatpush3.xpose.msra.mxu1 %v726_v56  ;;  %946 = vst [vmem:[%s2400_s5 + $0x120] sm:$0xff] %v725_v25  ;;  %992 = vmatprep.subr.mxu0 %v709_v12  ;;  %v1273_v43 = vld [vmem:[%s2398_s1 + $0x18] sm:$0xff]  ;;  %v1280_v12 = vld [vmem:[%s2398_s1 + $0x108] sm:$0xff] }
 0x106   :  { %v1227_v42 = vpop.eup %1226  ;;  %v446_v51 = vsel %vm444_vm9, %v445_v48, %v443_v28  ;;  %v326_v2 = vand.u32 2147483648, %v2102_v9  ;;  %1043 = vmatprep.subr.mxu1 %v1285_v58  ;;  %929 = vst [vmem:[%s2400_s5 + $0x98] sm:$0xff] %v708_v49  ;;  %v1287_v4 = vmov 0   ;;  %vm435_vm13 = vcmp.eq.f32.partialorder %v2155_v41, inf }
 0x107   :  { %v1229_v29 = vpop.eup %1228  ;;  %1242 = vrcp.f32 %v546_v13  ;;  %v578_v57 = vmax.f32 %v446_v51, 1e-12  ;;  %v324_v60 = vsel %vm323_vm11, %v2102_v9, %v322_v38  ;;  %v692_v59 = vmul.f32 %v1273_v43, %v1227_v42  ;;  %1059 = vset.pattern.permute.xlu0 %v1287_v4 }
 0x108   :  { %v327_v7 = vsel %vm325_vm12, %v326_v2, %v324_v60  ;;  %v434_v6 = vmul.f32 %v1229_v29, %v2155_v41  ;;  %890 = vperm.xlu0 %1059, %v888_v62   ;;  %v1231_v53 = vpop.eup %1230  ;;  %v438_v11 = vand.u32 2147483648, %v2155_v41  ;;  %993 = vmatpush3.xpose.msra.mxu0 %v693_v37  ;;  %vm437_vm14 = vcmp.eq.f32.partialorder %v2155_v41, 0.0  ;;  %v1282_v37 = vld [vmem:[%s2398_s1 + $0x100] sm:$0xff] }
 0x109   :  { %1244 = vrcp.f32 %v578_v57  ;;  %v561_v19 = vmax.f32 %v327_v7, 1e-12  ;;  %1044 = vmatpush3.xpose.msra.mxu1 %v725_v25  ;;  %913 = vst [vmem:[%s2400_s5 + $0x18] sm:$0xff] %v692_v59  ;;  %v210_v52 = vmul.f32 %v1231_v53, %v2172_v3  ;;  %vm211_vm15 = vcmp.eq.f32.partialorder %v2172_v3, inf  ;;  %994 = vmatprep.subr.mxu0 %v708_v49 }
 0x10a   :  { %v1233_v9 = vpop.eup %1232  ;;  %v436_v50 = vsel %vm435_vm13, %v2155_v41, %v434_v6  ;;  %1045 = vmatprep.subr.mxu1 %v1285_v58  ;;  %v214_v26 = vand.u32 2147483648, %v2172_v3  ;;  %vm213_vm0 = vcmp.eq.f32.partialorder %v2172_v3, 0.0  ;;  %v879_v25 = vlaneseq }
 0x10b   :  { %v1235_v14 = vpop.eup %1234  ;;  %1246 = vrcp.f32 %v561_v19  ;;  %v439_v15 = vsel %vm437_vm14, %v438_v11, %v436_v50  ;;  %v724_v22 = vmul.f32 %v1274_v17, %v1233_v9  ;;  %v212_v41 = vsel %vm211_vm15, %v2172_v3, %v210_v52  ;;  %v1276_v3 = vld [vmem:[%s2398_s1 + $0x110] sm:$0xff] }
 0x10c   :  { %v577_v16 = vmax.f32 %v439_v15, 1e-12  ;;  %v707_v54 = vmul.f32 %v1275_v18, %v1235_v14  ;;  %v215_v23 = vsel %vm213_vm0, %v214_v26, %v212_v41  ;;  %995 = vmatpush3.xpose.msra.mxu0 %v692_v59  ;;  %v880_v47 = vand.u32 127, %v879_v25 }
 0x10d   :  { %v1237_v39 = vpop.eup %1236  ;;  %1046 = vmatpush3.xpose.msra.mxu1 %v724_v22  ;;  %945 = vst [vmem:[%s2400_s5 + $0x118] sm:$0xff] %v724_v22  ;;  %v545_v20 = vmax.f32 %v215_v23, 1e-12 }
 0x10e   :  { %1248 = vrcp.f32 %v577_v16  ;;  %996 = vmatprep.subr.mxu0 %v707_v54  ;;  %928 = vst [vmem:[%s2400_s5 + $0x90] sm:$0xff] %v707_v54  ;;  %1047 = vmatprep.subr.mxu1 %v1285_v58  ;;  %v723_v1 = vmul.f32 %v1276_v3, %v1237_v39  ;;  %v882_v5 = vadd.s32 256, %v880_v47  ;;  %v881_v61 = vadd.s32 128, %v880_v47 }
 0x10f   :  { %v1239_v30 = vpop.eup %1238  ;;  %1250 = vrcp.f32 %v545_v20 }
 0x110   :  { %v691_v0 = vmul.f32 %v1277_v31, %v1239_v30  ;;  %944 = vst [vmem:[%s2400_s5 + $0x110] sm:$0xff] %v723_v1 }
 0x111   :  { %1048 = vmatpush3.xpose.msra.mxu1 %v723_v1 }
 0x112   :  { %v1241_v24 = vpop.eup %1240  ;;  %997 = vmatpush3.xpose.msra.mxu0 %v691_v0  ;;  %912 = vst [vmem:[%s2400_s5 + $0x10] sm:$0xff] %v691_v0  ;;  %1049 = vmatprep.subr.mxu1 %v1285_v58 }
 0x113   :  { %v706_v8 = vmul.f32 %v1278_v55, %v1241_v24 }
 0x114   :  { %v1243_v27 = vpop.eup %1242 }
 0x115   :  { %998 = vmatprep.subr.mxu0 %v706_v8  ;;  %927 = vst [vmem:[%s2400_s5 + $0x88] sm:$0xff] %v706_v8  ;;  %v690_v21 = vmul.f32 %v1279_v32, %v1243_v27 }
 0x116   :  { %v1245_v33 = vpop.eup %1244 }
 0x117   :  { %999 = vmatpush3.xpose.msra.mxu0 %v690_v21  ;;  %911 = vst [vmem:[%s2400_s5 + $0x8] sm:$0xff] %v690_v21  ;;  %v722_v34 = vmul.f32 %v1280_v12, %v1245_v33 }
 0x118   :  { %v1247_v35 = vpop.eup %1246 }
 0x119   :  { %v705_v56 = vmul.f32 %v1281_v36, %v1247_v35  ;;  %1050 = vmatpush3.xpose.msra.mxu1 %v722_v34  ;;  %943 = vst [vmem:[%s2400_s5 + $0x108] sm:$0xff] %v722_v34 }
 0x11a   :  { %1051 = vmatprep.subr.mxu1 %v1285_v58 }
 0x11b   :  { %v1249_v10 = vpop.eup %1248  ;;  %1000 = vmatprep.subr.mxu0 %v705_v56  ;;  %926 = vst [vmem:[%s2400_s5 + $0x80] sm:$0xff] %v705_v56 }
 0x11c   :  { %v721_v63 = vmul.f32 %v1282_v37, %v1249_v10  ;;  %v1251_v45 = vpop.eup %1250 }
 0x11d   :  { %v689_v46 = vmul.f32 %v1283_v40, %v1251_v45 }
 0x11e   :  { %1052 = vmatpush3.xpose.msra.mxu1 %v721_v63  ;;  %942 = vst [vmem:[%s2400_s5 + $0x100] sm:$0xff] %v721_v63 }
 0x11f   :  { %1001 = vmatpush3.xpose.msra.mxu0 %v689_v46  ;;  %910 = vst [vmem:[%s2400_s5] sm:$0xff] %v689_v46 }
 0x121   :  { %1054 = vmatmul.mubr.f32.vlgmr.msra.gmra.mxu1 %v1284_v44 }
 0x122   :  { %1003 = vmatmul.mubr.f32.vlgmr.msra.gmra.mxu0 %v1284_v44 }
 0x183   :  { %v891_v48 = vpop.permute.xlu0 %890 }
 0x184   :  { %vm894_vm1 = vcmp.eq.s32.totalorder %v882_v5, %v891_v48  ;;  %vm892_vm2 = vcmp.eq.s32.totalorder %v880_v47, %v891_v48  ;;  %vm893_vm3 = vcmp.eq.s32.totalorder %v881_v61, %v891_v48 }
 0x185   :  { %v897_v49 = vsel %vm894_vm1, 0.35, %v1285_v58  ;;  %v895_v13 = vsel %vm892_vm2, 0.35, %v1285_v58  ;;  %v896_v42 = vsel %vm893_vm3, 0.35, %v1285_v58 }
 0x1e1   :  { %v875_v28 = vpop.f32.mrf.mxu1 }
 0x1e2   :  { %v900_v38 = vsub.f32 %v875_v28, %v897_v49  ;;  %906 = vst [vmem:[%s2402_s3 + $0x10] sm:$0xff] %v875_v28  ;;  %v804_v62 = vpop.f32.mrf.mxu0 }
 0x1e3   :  { %v1055_v51 = vpop.f32.mrf.mxu1  ;;  %v898_v2 = vsub.f32 %v804_v62, %v895_v13  ;;  %904 = vst [vmem:[%s2402_s3] sm:$0xff] %v804_v62 }
 0x1e4   :  { %v903_v29 = vmul.f32 30.0, %v900_v38  ;;  %v806_v57 = vpop.f32.mrf.mxu0 }
 0x1e5   :  { %v901_v60 = vmul.f32 30.0, %v898_v2  ;;  %v899_v43 = vsub.f32 %v806_v57, %v896_v42  ;;  %905 = vst [vmem:[%s2402_s3 + $0x8] sm:$0xff] %v806_v57 }
 0x1e6   :  { %909 = vst [vmem:[%s2403_s4 + $0x10] sm:$0xff] %v903_v29 }
 0x1e7   :  { %907 = vst [vmem:[%s2403_s4] sm:$0xff] %v901_v60  ;;  %v902_v58 = vmul.f32 30.0, %v899_v43 }
 0x1e9   :  { %908 = vst [vmem:[%s2403_s4 + $0x8] sm:$0xff] %v902_v58 }

</bundles_post_ra>
